<compile_context>
chip_gen: v7x
topology: tpu7x:2x2x1
jax: 0.10.0
libtpu: 0.0.40
codegen_flags: <defaults>
</compile_context>

<pallas_src>
import jax
import jax.numpy as jnp
from jax.experimental import pallas as pl
from jax.experimental.pallas import tpu as pltpu

Z = 32          # latent dim (args.z)
H = 128         # hidden dim
OUT = 20        # output features of linear2
BN_EPS = 1e-5
ELU_ALPHA = 1.0


def _stats_kernel(x_ref, w1_ref, stats_ref):
    # linear1 WITHOUT bias: the per-feature bias is exactly cancelled by the
    # BatchNorm (training-mode) mean subtraction.
    h = jnp.dot(x_ref[...], w1_ref[...], preferred_element_type=jnp.float32)
    ssum = jnp.sum(h, axis=0, keepdims=True)        # (1, H)
    ssq = jnp.sum(h * h, axis=0, keepdims=True)     # (1, H)
    stats_ref[0] = jnp.concatenate([ssum, ssq], axis=0)   # (2, H) per-tile partial


def _emit_kernel(x_ref, w1_ref, scale_ref, shift_ref, w2_ref, b2_ref, o_ref):
    # TODO(synk): optional fast path for small/medium B could cache h from pass 1 in a
    # persistent VMEM scratch and skip this recompute / second x read.
    h = jnp.dot(x_ref[...], w1_ref[...], preferred_element_type=jnp.float32)
    hn = h * scale_ref[...] + shift_ref[...]        # folded BN affine (one VPU pass)
    act = jnp.where(hn > 0, hn, ELU_ALPHA * jnp.expm1(hn))
    out = jnp.dot(act, w2_ref[...], preferred_element_type=jnp.float32) + b2_ref[...]
    o_ref[...] = out.astype(o_ref.dtype)            # (tb, 20): no 128-lane padding


def _pick_tiling():
    """Per-generation defaults: (max batch-tile rows, scoped VMEM limit bytes)."""
    try:
        info = pltpu.get_tpu_info()
        vmem_cap = getattr(info, "vmem_capacity_bytes", 64 << 20)
    except Exception:
        vmem_cap = 64 << 20                     # be conservative (v7x-sized VMEM)
    if vmem_cap >= (100 << 20):                 # v5e / v6e: 128 MiB physical VMEM
        return 8192, 80 << 20
    return 4096, 40 << 20                       # v7x: 64 MiB physical VMEM


def generator_w1_forward(x, params, *, batch_tile=None):
    """x: (B, Z) float32 -> (B, 1, OUT) float32."""
    B = x.shape[0]
    assert x.shape[1] == Z, x.shape

    tb_auto, vmem_limit = _pick_tiling()
    tb = tb_auto if batch_tile is None else min(batch_tile, tb_auto)
    tb = min(tb, -(-B // 8) * 8)                # no bigger than (padded) batch
    tb = max(8, (tb // 8) * 8)                  # multiple of 8 sublanes
    num_tiles = -(-B // tb)
    b_pad = num_tiles * tb

    if b_pad != B:
        # Zero rows contribute 0 to sum/sumsq (kernel linear1 has no bias), so the
        # batch statistics (divided by the true B) stay correct.
        x = jnp.pad(x, ((0, b_pad - B), (0, 0)))

    # TODO(synk): x could be cast to bf16 here to halve its (now dominant) HBM read
    # traffic; kept f32 to stay well inside the 1e-4 reference tolerance.
    w1 = params["w1"]
    w2 = params["w2"]
    b2 = params["b2"]
    gamma = params["gamma"]
    beta = params["beta"]

    cparams = pltpu.CompilerParams(
        dimension_semantics=("parallel",),      # independent batch tiles -> megacore OK
        vmem_limit_bytes=vmem_limit,
    )

    # ---- Pass 1: per-tile partial BN statistics of h = x @ w1 ----
    partial = pl.pallas_call(
        _stats_kernel,
        out_shape=jax.ShapeDtypeStruct((num_tiles, 2, H), jnp.float32),
        grid_spec=pltpu.PrefetchScalarGridSpec(
            num_scalar_prefetch=0,
            grid=(num_tiles,),
            in_specs=[
                pl.BlockSpec((tb, Z), lambda t: (t, 0)),      # x tile
                pl.BlockSpec((Z, H), lambda t: (0, 0)),       # w1 (resident)
            ],
            out_specs=pl.BlockSpec((1, 2, H), lambda t: (t, 0, 0)),
        ),
        compiler_params=cparams,
    )(x, w1)

    # ---- Tiny XLA glue: reduce partials, fold BN affine once ----
    totals = jnp.sum(partial, axis=0)                         # (2, H)
    mean = (totals[0] / B).reshape(1, H)
    ex2 = (totals[1] / B).reshape(1, H)
    var = jnp.maximum(ex2 - mean * mean, 0.0)                 # guard cancellation
    scale = gamma.reshape(1, H) * jax.lax.rsqrt(var + BN_EPS)
    shift = beta.reshape(1, H) - mean * scale

    # ---- Pass 2: normalize + ELU + linear2, lane-exact (tb, 20) HBM writeback ----
    out_padded = pl.pallas_call(
        _emit_kernel,
        out_shape=jax.ShapeDtypeStruct((b_pad, OUT), jnp.float32),
        grid_spec=pltpu.PrefetchScalarGridSpec(
            num_scalar_prefetch=0,
            grid=(num_tiles,),
            in_specs=[
                pl.BlockSpec((tb, Z), lambda t: (t, 0)),      # x tile
                pl.BlockSpec((Z, H), lambda t: (0, 0)),       # w1 (resident)
                pl.BlockSpec((1, H), lambda t: (0, 0)),       # folded scale
                pl.BlockSpec((1, H), lambda t: (0, 0)),       # folded shift
                pl.BlockSpec((H, OUT), lambda t: (0, 0)),     # w2 (unpadded)
                pl.BlockSpec((1, OUT), lambda t: (0, 0)),     # b2 (unpadded)
            ],
            out_specs=pl.BlockSpec((tb, OUT), lambda t: (t, 0)),
        ),
        compiler_params=cparams,
    )(x, w1, scale, shift, w2, b2)

    # Drop padded rows; x.view(-1, 1, 20) is pure reshape glue.
    return out_padded[:B].reshape(-1, 1, OUT)


def init_params(key):
    k1, k2, k3, k4 = jax.random.split(key, 4)
    # PyTorch-Linear-like uniform init U(-1/sqrt(fan_in), 1/sqrt(fan_in)).
    lim1 = 1.0 / (Z ** 0.5)
    lim2 = 1.0 / (H ** 0.5)
    return {
        "w1": jax.random.uniform(k1, (Z, H), jnp.float32, -lim1, lim1),
        "b1": jax.random.uniform(k2, (1, H), jnp.float32, -lim1, lim1),  # API compat;
        # b1 is elided in-kernel (valid for training-mode BN batch stats only).
        "gamma": jnp.ones((1, H), jnp.float32),   # BatchNorm1d weight
        "beta": jnp.zeros((1, H), jnp.float32),   # BatchNorm1d bias
        "w2": jax.random.uniform(k3, (H, OUT), jnp.float32, -lim2, lim2),
        "b2": jax.random.uniform(k4, (1, OUT), jnp.float32, -lim2, lim2),
    }


def _reference(x, p):
    # Mirrors the PyTorch module exactly (including the b1 add the kernel elides).
    h = x @ p["w1"] + p["b1"]
    mean = jnp.mean(h, axis=0, keepdims=True)
    var = jnp.mean((h - mean) ** 2, axis=0, keepdims=True)
    hn = (h - mean) / jnp.sqrt(var + BN_EPS) * p["gamma"] + p["beta"]
    act = jnp.where(hn > 0, hn, ELU_ALPHA * jnp.expm1(hn))
    return (act @ p["w2"] + p["b2"]).reshape(-1, 1, OUT)


if __name__ == "__main__":
    key = jax.random.PRNGKey(0)
    kx, kx2, kp = jax.random.split(key, 3)
    params = init_params(kp)

    # Small case matching typical use (single tile).
    B = 8
    x = jax.random.normal(kx, (B, Z), jnp.float32)
    out = jax.block_until_ready(generator_w1_forward(x, params))
    ref = _reference(x, params)
    assert out.shape == (B, 1, OUT), out.shape
    assert jnp.allclose(out, ref, atol=1e-4, rtol=1e-4), "mismatch vs reference (B=8)"

    # Multi-tile + padded-batch path (exercises per-tile partial stats + reduction).
    B2 = 40
    x2 = jax.random.normal(kx2, (B2, Z), jnp.float32)
    out2 = jax.block_until_ready(generator_w1_forward(x2, params, batch_tile=16))
    ref2 = _reference(x2, params)
    assert out2.shape == (B2, 1, OUT), out2.shape
    assert jnp.allclose(out2, ref2, atol=1e-4, rtol=1e-4), "mismatch vs reference (B=40)"

    print("KERNEL_OK")
</pallas_src>

<mosaic_0001>
module attributes {stable_mosaic.version = 11 : i64} {
  func.func @_stats_kernel(%arg0: i32, %arg1: memref<8x32xf32, #tpu.memory_space<vmem>>, %arg2: memref<32x128xf32, #tpu.memory_space<vmem>>, %arg3: memref<1x2x128xf32, #tpu.memory_space<vmem>>) attributes {dimension_semantics = [#tpu.dimension_semantics<parallel>], iteration_bounds = array<i64: 1>, scalar_prefetch = 0 : i64, scratch_operands = 0 : i64, tpu.core_type = #tpu.core_type<tc>, window_params = [{transform_indices = @transform_0, window_bounds = array<i64: 8, 32>}, {pipeline_mode = #tpu.pipeline_mode<synchronous>, transform_indices = @transform_1, window_bounds = array<i64: 32, 128>}, {transform_indices = @transform_2, window_bounds = array<i64: 1, 2, 128>}]} {
    %c0 = arith.constant 0 : index
    %c0_0 = arith.constant 0 : index
    %0 = vector.load %arg1[%c0, %c0_0] : memref<8x32xf32, #tpu.memory_space<vmem>>, vector<8x32xf32>
    %c0_1 = arith.constant 0 : index
    %c0_2 = arith.constant 0 : index
    %1 = vector.load %arg2[%c0_1, %c0_2] : memref<32x128xf32, #tpu.memory_space<vmem>>, vector<32x128xf32>
    %cst = arith.constant dense<0.000000e+00> : vector<8x128xf32>
    %2 = tpu.matmul %0, %1, %cst {dimension_numbers = #tpu.dot_dimension_numbers<[1], [0], [0], [1], [0, 0, 1, 1], [], []>} : vector<8x32xf32>, vector<32x128xf32>, vector<8x128xf32> -> vector<8x128xf32>
    %cst_3 = arith.constant dense<0.000000e+00> : vector<128xf32>
    %3 = vector.multi_reduction <add>, %2, %cst_3 [0] : vector<8x128xf32> to vector<128xf32>
    %4 = vector.shape_cast %3 : vector<128xf32> to vector<1x128xf32>
    %5 = arith.mulf %2, %2 : vector<8x128xf32>
    %cst_4 = arith.constant dense<0.000000e+00> : vector<128xf32>
    %6 = vector.multi_reduction <add>, %5, %cst_4 [0] : vector<8x128xf32> to vector<128xf32>
    %7 = vector.shape_cast %6 : vector<128xf32> to vector<1x128xf32>
    %8 = tpu.concatenate %4, %7 in 0 : vector<1x128xf32>, vector<1x128xf32> -> vector<2x128xf32>
    %c0_5 = arith.constant 0 : index
    %c0_6 = arith.constant 0 : index
    %c0_7 = arith.constant 0 : index
    %9 = vector.load %arg3[%c0_5, %c0_6, %c0_7] : memref<1x2x128xf32, #tpu.memory_space<vmem>>, vector<1x2x128xf32>
    %10 = vector.shape_cast %9 : vector<1x2x128xf32> to vector<2x128xf32>
    %11 = vector.shape_cast %8 : vector<2x128xf32> to vector<1x2x128xf32>
    tpu.vector_store %arg3[%c0_5, %c0_6, %c0_7], %11 {strides = array<i32>} : memref<1x2x128xf32, #tpu.memory_space<vmem>>, vector<1x2x128xf32>,
    return
  }
  func.func @transform_0(%arg0: i32) -> (i32, i32) {
    %c0_i32 = arith.constant 0 : i32
    %c0_i32_0 = arith.constant 0 : i32
    return %arg0, %c0_i32 : i32, i32
  }
  func.func @transform_1(%arg0: i32) -> (i32, i32) {
    %c0_i32 = arith.constant 0 : i32
    %c0_i32_0 = arith.constant 0 : i32
    %c0_i32_1 = arith.constant 0 : i32
    return %c0_i32, %c0_i32_0 : i32, i32
  }
  func.func @transform_2(%arg0: i32) -> (i32, i32, i32) {
    %c0_i32 = arith.constant 0 : i32
    %c0_i32_0 = arith.constant 0 : i32
    %c0_i32_1 = arith.constant 0 : i32
    return %arg0, %c0_i32, %c0_i32_0 : i32, i32, i32
  }
}

</mosaic_0001>

<bundles_post_ra>
// kernel: tpu_custom_call.1
= control target key start
LH: loop header
LB: loop body
LE: loop exit
PB: predicated region body
PF: predicated region fallthrough
CT: control target
= control target key end

     0   :  { %7 = vsyncpa [#allocation3], 0  ;;  %s318_s0 = inlined_call_operand.hbm [shape: f32[8,32], index: 0, kind: input, shape index: {}]   ;;  %s319_s1 = inlined_call_operand.hbm [shape: f32[32,128], index: 1, kind: input, shape index: {}]   ;;  %s320_s2 = inlined_call_operand.hbm [shape: f32[1,2,128], index: 2, kind: output, shape index: {}]  }
   0x1   :  { %8 = vsyncpa [#allocation6], 0 }
   0x2   :  { %9 = vsyncpa [#allocation4], 0  ;;  %s252_s9 = smov [#allocation2]   ;;  %s253_s11 = smov [#allocation5]  }
   0x3   :  { %s16_s10 = sshll.u32 %s252_s9, 4  ;;  %s25_s12 = sshll.u32 %s253_s11, 4  ;;  %s17_s10 = int_to_ptr.vmem [resolvable:$true] %s16_s10  ;;  %s275_s12 = int_to_ptr.vmem [resolvable:$true] %s25_s12 }
   0x4   :  { %s180_s15 = scalar_lea.hbm %s318_s0, 128 }
   0x5   :  { %p181_p0 = scmp.ne.s32.totalorder %s318_s0, %s180_s15  ;;  %p184_p1 = scmp.lt.u32.totalorder %s180_s15, %s318_s0 }
   0x7   :  { %p186_p2 = pnand %p184_p1, %p181_p0 }
   0x9   :  { %189 = shalt.err (!%p186_p2)
}
   0xa   :  { %s190_s20 = scalar_lea.vmem %s17_s10, 128  ;;  %p195_p4 = scmp.lt.s32.totalorder %s17_s10, %s17_s10 }
   0xb   :  { %p191_p3 = scmp.ne.s32.totalorder %s17_s10, %s190_s20  ;;  %p196_p5 = scmp.lt.s32.totalorder %s190_s20, %s190_s20 }
   0xd   :  { %p197_p6 = por %p196_p5, %p195_p4 }
   0xf   :  { %p198_p7 = pnand %p197_p6, %p191_p3 }
  0x11   :  { %201 = shalt.err (!%p198_p7)
}
  0x12   :  { %19 = dma.hbm_to_vmem [thread:$0]  %s318_s0, 128, %s17_s10, [#allocation3]  }
  0x13   :  { %s202_s25 = scalar_lea.hbm %s319_s1, 512 }
  0x14   :  { %p203_p8 = scmp.ne.s32.totalorder %s319_s1, %s202_s25  ;;  %p206_p9 = scmp.lt.u32.totalorder %s202_s25, %s319_s1 }
  0x16   :  { %p208_p10 = pnand %p206_p9, %p203_p8 }
  0x18   :  { %211 = shalt.err (!%p208_p10)
}
  0x19   :  { %s212_s30 = scalar_lea.vmem %s275_s12, 512  ;;  %p217_p12 = scmp.lt.s32.totalorder %s275_s12, %s275_s12 }
  0x1a   :  { %p213_p11 = scmp.ne.s32.totalorder %s275_s12, %s212_s30  ;;  %p218_p13 = scmp.lt.s32.totalorder %s212_s30, %s212_s30 }
  0x1c   :  { %p219_p0 = por %p218_p13, %p217_p12 }
  0x1e   :  { %p220_p1 = pnand %p219_p0, %p213_p11 }
  0x20   :  { %223 = shalt.err (!%p220_p1)
}
  0x21   :  { %s254_s0 = smov 128   ;;  %s255_s3 = smov 8  }
  0x22   :  { %31 = dma.hbm_to_vmem [thread:$0]  %s319_s1, 512, %s275_s12, [#allocation6], %s254_s0, %s254_s0, %s255_s3  }
  0x23   :  { %246 = dma.done.wait [#allocation3], 128  }
  0x24   :  { %247 = vsyncadd [#allocation3], 4294967168 }
  0x25   :  { %248 = dma.done.wait [#allocation6], 512  }
  0x26   :  { %249 = vsyncadd [#allocation6], 4294966784  ;;  %v256_v0 = vmov 0.0|0.0   ;;  %vm257_vm0 = vmmov 0   ;;  %v258_v1 = vmov 0.0   ;;  %v39_v2 = vld [vmem:[#allocation5] sm:$0xff] }
  0x27   :  { %166 = vmatprep.subr.bf16.mxu0 %v256_v0  ;;  %163 = vmatprep.mubr.msk.f32.mxu0 %vm257_vm0, %v258_v1  ;;  %v40_v3 = vld [vmem:[#allocation5 + $0x8] sm:$0xff]  ;;  %v41_v4 = vld [vmem:[#allocation5 + $0x10] sm:$0xff]  ;;  %v42_v6 = vld [vmem:[#allocation5 + $0x18] sm:$0xff]  ;;  %vm43_vm1 = vcmask 261120   ;;  %s259_s1 = smov [#allocation7]   ;;  %vm130_vm2 = vcmask 1040384  }
  0x28   :  { %v167_v5 = vpack.c.bf16 %v40_v3, %v39_v2  ;;  %v170_v7 = vpack.c.bf16 %v42_v6, %v41_v4  ;;  %v38_v8 = vld [vmem:[#allocation2] sm:$0xff]  ;;  %s139_s6 = sshll.u32 %s259_s1, 4  ;;  %s140_s6 = int_to_ptr.vmem [resolvable:$true] %s139_s6 }
  0x29   :  { %s224_s7 = scalar_lea.vmem %s140_s6, 32  ;;  %p229_p3 = scmp.lt.s32.totalorder %s140_s6, %s140_s6 }
  0x2a   :  { %168 = vmatpush3.bf16.msra.mxu0 %v167_v5  ;;  %p225_p2 = scmp.ne.s32.totalorder %s140_s6, %s224_s7  ;;  %p230_p4 = scmp.lt.s32.totalorder %s224_s7, %s224_s7 }
  0x2b   :  { %169 = vmatprep.subr.bf16.mxu0 %v256_v0 }
  0x2c   :  { %p231_p5 = por %p230_p4, %p229_p3 }
  0x2e   :  { %171 = vmatpush3.bf16.msra.mxu0 %v170_v7  ;;  %p232_p6 = pnand %p231_p5, %p225_p2 }
  0x31   :  { %164 = vmatmul.mubr.msk.f32.vlgmr.msra.gmra.mrb[0].mxu0 %vm43_vm1, %v38_v8 }
 0x104   :  { %v113_v9 = vpop.f32.mrb[0].mxu0 }
 0x105   :  { %v117_v10 = vrot.slane %v113_v9, 4  ;;  %v123_v11 = vmul.f32 %v113_v9, %v113_v9  ;;  %v165_v12 = vpop.f32.mrb[1].mxu0 }
 0x107   :  { %v118_v13 = vadd.f32 %v117_v10, %v113_v9  ;;  %v124_v14 = vrot.slane %v123_v11, 4 }
 0x109   :  { %v119_v15 = vrot.slane %v118_v13, 2  ;;  %v125_v16 = vadd.f32 %v124_v14, %v123_v11 }
 0x10b   :  { %v120_v17 = vadd.f32 %v119_v15, %v118_v13  ;;  %v126_v18 = vrot.slane %v125_v16, 2 }
 0x10d   :  { %v121_v19 = vrot.slane %v120_v17, 1  ;;  %v127_v20 = vadd.f32 %v126_v18, %v125_v16 }
 0x10f   :  { %v128_v21 = vrot.slane %v127_v20, 1  ;;  %v122_v22 = vadd.f32 %v121_v19, %v120_v17 }
 0x111   :  { %v129_v23 = vadd.f32 %v128_v21, %v127_v20 }
 0x113   :  { %v131_v24 = vsel %vm130_vm2, %v122_v22, %v129_v23 }
 0x114   :  { %132 = vst [vmem:[#allocation7] sm:$0x3] %v131_v24 }
 0x115   :  { %235 = shalt.err (!%p232_p6)
}
 0x116   :  { %s236_s10 = scalar_lea.hbm %s320_s2, 32 }
 0x117   :  { %p237_p7 = scmp.ne.s32.totalorder %s320_s2, %s236_s10  ;;  %p240_p8 = scmp.lt.u32.totalorder %s236_s10, %s320_s2 }
 0x119   :  { %p242_p9 = pnand %p240_p8, %p237_p7 }
 0x11b   :  { %245 = shalt.err (!%p242_p9)
}
 0x11c   :  { %142 = dma.vmem_to_hbm [thread:$0]  %s140_s6, 32, %s320_s2, [#allocation4]  }
 0x11d   :  { %250 = dma.done.wait [#allocation4], 32  }
 0x11e   :  { %251 = vsyncadd [#allocation4], 4294967264 }
 0x11f   :  { %146 = vsyncpa [#allocation3], 1 }
 0x120   :  { %147 = vsyncpa [#allocation6], 1 }
 0x121   :  { %148 = vsyncpa [#allocation4], 1 }

</bundles_post_ra>
